<compile_context>
chip_gen: v5e
topology: v5e:2x2
jax: 0.10.0
libtpu: 0.0.40
codegen_flags: <defaults>
</compile_context>

<pallas_src>
import functools

import jax
import jax.numpy as jnp
from jax import lax
from jax.experimental import pallas as pl
from jax.experimental.pallas import tpu as pltpu

# Pad granularity.  TODO(synk): use 256 on v6e/v7x (2x256x256 MXU) when the
# model dims are large enough that the extra zero-padding is amortized.
LANE = 128


def _round_up(n, m):
    return ((n + m - 1) // m) * m


def _vmem_limit_bytes(per_layer_bytes, resident_bytes):
    """Scoped-VMEM budget: double-buffered per-layer weights + resident blocks."""
    est = 2 * per_layer_bytes + resident_bytes
    # TODO(synk): cap at ~56 MiB when targeting v7x (64 MiB physical VMEM / TC).
    return int(min(max(1.5 * est, 32 * 2 ** 20), 100 * 2 ** 20))


# ----------------------------------------------------------------------------
# BlockSpec helpers
# ----------------------------------------------------------------------------
def _const(shape):
    """Whole-array block, constant index -> resident, single-buffered."""
    zeros = (0,) * len(shape)
    return pl.BlockSpec(tuple(shape), lambda l, _z=zeros: _z,
                        pipeline_mode=pl.Buffered(1))


def _layered(shape):
    """Leading layer axis selected by the grid index (weight prefetch)."""
    n_trailing = len(shape) - 1
    return pl.BlockSpec((None,) + tuple(shape[1:]),
                        lambda l, _n=n_trailing: (l,) + (0,) * _n)


# ----------------------------------------------------------------------------
# In-kernel helpers (traced inside the Pallas kernels)
# ----------------------------------------------------------------------------
def _proj(x_bf16, w_bf16, b_row_f32):
    """x @ w (bf16 MXU, f32 accumulate) + bias."""
    y = jnp.dot(x_bf16, w_bf16, preferred_element_type=jnp.float32)
    return y + b_row_f32


def _softmax_rows(s, exact=False):
    m = jnp.max(s, axis=-1, keepdims=True)
    p = jnp.exp(s - m)
    denom = jnp.sum(p, axis=-1, keepdims=True)
    if exact:
        return p / denom                                  # normalized output dist
    return p * pl.reciprocal(denom, approx=True)          # EUP approx (attention)


def _attention(q, k, v_bf16, *, mask=None, causal=False, q_tile=256):
    """softmax(q k^T [+mask][causal]) v.  1/sqrt(d_k) is pre-folded into Wq/bq."""
    kb = k.astype(jnp.bfloat16)
    rows = q.shape[0]

    def block(r0, q_blk, mask_blk):
        s = lax.dot_general(q_blk.astype(jnp.bfloat16), kb,
                            (((1,), (1,)), ((), ())),      # contract last dims
                            preferred_element_type=jnp.float32)
        if mask_blk is not None:
            s = s + mask_blk                               # additive f32 mask
        if causal:
            r = r0 + lax.broadcasted_iota(jnp.int32, s.shape, 0)
            c = lax.broadcasted_iota(jnp.int32, s.shape, 1)
            s = jnp.where(r >= c, s, -1e30)                # in-kernel causal mask
        p = _softmax_rows(s)
        return jnp.dot(p.astype(jnp.bfloat16), v_bf16,
                       preferred_element_type=jnp.float32)

    if rows <= q_tile:
        return block(0, q, mask)
    # TODO(synk): switch to an online-softmax fori_loop to fully bound live
    # ranges; the static q-tile loop already avoids one whole (rows,rows) score.
    outs = []
    for r0 in range(0, rows, q_tile):
        mask_blk = None if mask is None else mask[r0:r0 + q_tile]
        outs.append(block(r0, q[r0:r0 + q_tile], mask_blk))
    return jnp.concatenate(outs, axis=0)


def _layernorm(x, g_row, b_row, d_valid, valid, eps=1e-5):
    """LayerNorm over the first d_valid lanes of a lane-padded [L, Dmp] tile.

    Relies on the invariant that padded lanes of x are exactly zero (weights,
    biases and gammas are zero in the pad region), so the mean needs no mask.
    """
    inv_n = 1.0 / float(d_valid)
    mu = jnp.sum(x, axis=-1, keepdims=True) * inv_n
    if valid is None:                       # d_model is a multiple of LANE
        d = x - mu
    else:                                   # hoisted (1, Dmp) validity mask
        d = jnp.where(valid, x - mu, 0.0)
    var = jnp.sum(d * d, axis=-1, keepdims=True) * inv_n
    return d * lax.rsqrt(var + eps) * g_row + b_row


# ----------------------------------------------------------------------------
# Encoder stack kernel: grid = (n_layers,), f32 activation carried in scratch.
# vec rows: 0 bqkv, 1 bo, 2 b1, 3 b2, 4 ln1g, 5 ln1b, 6 ln2g, 7 ln2b
# ----------------------------------------------------------------------------
def _encoder_stack_kernel(*refs, d_model, has_mask, q_tile):
    if has_mask:
        (x_ref, wqkv_ref, wo_ref, w1_ref, w2_ref, vecs_ref, mask_ref,
         o_ref, h_ref) = refs
        src_mask = mask_ref[...]
    else:
        (x_ref, wqkv_ref, wo_ref, w1_ref, w2_ref, vecs_ref,
         o_ref, h_ref) = refs
        src_mask = None

    Dmp = h_ref.shape[-1]
    Dvp = wo_ref.shape[0]
    Dfp = w1_ref.shape[-1]
    Wqkv = wqkv_ref.shape[-1]
    Dkp = (Wqkv - Dvp) // 2

    @pl.when(pl.program_id(0) == 0)
    def _():
        h_ref[...] = x_ref[...]

    x = h_ref[...]
    vecs = vecs_ref[...]
    valid = None
    if d_model != Dmp:
        valid = lax.broadcasted_iota(jnp.int32, (1, Dmp), 1) < d_model

    # --- self attention (fused QKV projection) --------------------------------
    xb = x.astype(jnp.bfloat16)
    qkv = _proj(xb, wqkv_ref[...], vecs[0:1, :Wqkv])
    q, k, v = qkv[:, :Dkp], qkv[:, Dkp:2 * Dkp], qkv[:, 2 * Dkp:]
    a = _attention(q, k, v.astype(jnp.bfloat16), mask=src_mask, q_tile=q_tile)
    a = _proj(a.astype(jnp.bfloat16), wo_ref[...], vecs[1:2, :Dmp])
    x = _layernorm(x + a, vecs[4:5, :Dmp], vecs[5:6, :Dmp], d_model, valid)

    # --- feed forward ----------------------------------------------------------
    f = _proj(x.astype(jnp.bfloat16), w1_ref[...], vecs[2:3, :Dfp])
    f = jnp.maximum(f, 0.0)
    f = _proj(f.astype(jnp.bfloat16), w2_ref[...], vecs[3:4, :Dmp])
    x = _layernorm(x + f, vecs[6:7, :Dmp], vecs[7:8, :Dmp], d_model, valid)

    h_ref[...] = x

    @pl.when(pl.program_id(0) == pl.num_programs(0) - 1)
    def _():
        o_ref[...] = x.astype(jnp.bfloat16)       # bf16 hidden out (half the DMA)


def encoder_stack(x_pad, enc_w, source_mask, d_model, *, q_tile=256,
                  vmem_limit=None):
    S, Dmp = x_pad.shape
    wqkv, wo, w1, w2, vecs = (enc_w["wqkv"], enc_w["wo"], enc_w["w1"],
                              enc_w["w2"], enc_w["vecs"])
    n_layers = wqkv.shape[0]
    has_mask = source_mask is not None

    in_specs = [_const((S, Dmp)),
                _layered(wqkv.shape), _layered(wo.shape),
                _layered(w1.shape), _layered(w2.shape), _layered(vecs.shape)]
    args = [x_pad, wqkv, wo, w1, w2, vecs]
    if has_mask:
        in_specs.append(_const(source_mask.shape))
        args.append(source_mask)

    if vmem_limit is None:
        per_layer = sum(int(v.nbytes) for v in (wqkv, wo, w1, w2, vecs)) // n_layers
        resident = 2 * int(x_pad.nbytes) + int(x_pad.nbytes) // 2
        scores = 3 * min(S, q_tile) * S * 4
        vmem_limit = _vmem_limit_bytes(per_layer, resident + scores)

    return pl.pallas_call(
        functools.partial(_encoder_stack_kernel, d_model=d_model,
                          has_mask=has_mask, q_tile=q_tile),
        grid=(n_layers,),
        in_specs=in_specs,
        out_specs=pl.BlockSpec((S, Dmp), lambda l: (0, 0),
                               pipeline_mode=pl.Buffered(1)),
        out_shape=jax.ShapeDtypeStruct((S, Dmp), jnp.bfloat16),
        scratch_shapes=[pltpu.VMEM((S, Dmp), jnp.float32)],
        compiler_params=pltpu.CompilerParams(
            dimension_semantics=("arbitrary",),
            vmem_limit_bytes=vmem_limit),
    )(*args)


# ----------------------------------------------------------------------------
# Decoder stack kernel (final hidden states only; vocab projection is separate).
# vec rows: 0 sa_bqkv, 1 ca_bq, 2 ca_bkv, 3 sa_bo, 4 ca_bo, 5 b1, 6 b2,
#           7 ln1g, 8 ln1b, 9 ln2g, 10 ln2b, 11 ln3g, 12 ln3b
# ----------------------------------------------------------------------------
def _decoder_stack_kernel(*refs, d_model, causal, has_mask, q_tile):
    if has_mask:
        (tgt_ref, enc_ref, sa_wqkv_ref, sa_wo_ref, ca_wq_ref, ca_wkv_ref,
         ca_wo_ref, w1_ref, w2_ref, vecs_ref, mask_ref, o_ref, h_ref) = refs
        tgt_mask = mask_ref[...]
    else:
        (tgt_ref, enc_ref, sa_wqkv_ref, sa_wo_ref, ca_wq_ref, ca_wkv_ref,
         ca_wo_ref, w1_ref, w2_ref, vecs_ref, o_ref, h_ref) = refs
        tgt_mask = None

    Dmp = h_ref.shape[-1]
    Dfp = w1_ref.shape[-1]
    Wqkv = sa_wqkv_ref.shape[-1]
    Dkp = ca_wq_ref.shape[-1]
    Wkv = ca_wkv_ref.shape[-1]

    @pl.when(pl.program_id(0) == 0)
    def _():
        h_ref[...] = tgt_ref[...]

    x = h_ref[...]
    vecs = vecs_ref[...]
    valid = None
    if d_model != Dmp:
        valid = lax.broadcasted_iota(jnp.int32, (1, Dmp), 1) < d_model

    # --- masked self attention (fused QKV, causal mask built in-kernel) --------
    xb = x.astype(jnp.bfloat16)
    qkv = _proj(xb, sa_wqkv_ref[...], vecs[0:1, :Wqkv])
    q, k, v = qkv[:, :Dkp], qkv[:, Dkp:2 * Dkp], qkv[:, 2 * Dkp:]
    a = _attention(q, k, v.astype(jnp.bfloat16), mask=tgt_mask, causal=causal,
                   q_tile=q_tile)
    a = _proj(a.astype(jnp.bfloat16), sa_wo_ref[...], vecs[3:4, :Dmp])
    x = _layernorm(x + a, vecs[7:8, :Dmp], vecs[8:9, :Dmp], d_model, valid)

    # --- cross attention over encoder output (already bf16, no mask) -----------
    eb = enc_ref[...]
    q = _proj(x.astype(jnp.bfloat16), ca_wq_ref[...], vecs[1:2, :Dkp])
    kv = _proj(eb, ca_wkv_ref[...], vecs[2:3, :Wkv])
    k, v = kv[:, :Dkp], kv[:, Dkp:]
    c = _attention(q, k, v.astype(jnp.bfloat16), q_tile=q_tile)
    c = _proj(c.astype(jnp.bfloat16), ca_wo_ref[...], vecs[4:5, :Dmp])
    x = _layernorm(x + c, vecs[9:10, :Dmp], vecs[10:11, :Dmp], d_model, valid)

    # --- feed forward -----------------------------------------------------------
    f = _proj(x.astype(jnp.bfloat16), w1_ref[...], vecs[5:6, :Dfp])
    f = jnp.maximum(f, 0.0)
    f = _proj(f.astype(jnp.bfloat16), w2_ref[...], vecs[6:7, :Dmp])
    x = _layernorm(x + f, vecs[11:12, :Dmp], vecs[12:13, :Dmp], d_model, valid)

    h_ref[...] = x

    @pl.when(pl.program_id(0) == pl.num_programs(0) - 1)
    def _():
        o_ref[...] = x.astype(jnp.bfloat16)


def decoder_stack(tgt_pad, enc_out, dec_w, target_mask, d_model, *,
                  causal=False, q_tile=256, vmem_limit=None):
    T, Dmp = tgt_pad.shape
    S = enc_out.shape[0]
    mats = [dec_w[k] for k in ("sa_wqkv", "sa_wo", "ca_wq", "ca_wkv", "ca_wo",
                               "w1", "w2", "vecs")]
    n_layers = mats[0].shape[0]
    has_mask = target_mask is not None

    in_specs = [_const((T, Dmp)), _const((S, Dmp))]
    in_specs += [_layered(m.shape) for m in mats]
    args = [tgt_pad, enc_out] + mats
    if has_mask:
        assert target_mask.shape == (T, T), \
            "decoder self-attention mask must be (T, T)"
        in_specs.append(_const((T, T)))
        args.append(target_mask)

    if vmem_limit is None:
        per_layer = sum(int(m.nbytes) for m in mats) // n_layers
        resident = (2 * int(tgt_pad.nbytes) + int(tgt_pad.nbytes) // 2
                    + int(enc_out.nbytes))
        scores = 3 * min(T, q_tile) * max(S, T) * 4
        vmem_limit = _vmem_limit_bytes(per_layer, resident + scores)

    return pl.pallas_call(
        functools.partial(_decoder_stack_kernel, d_model=d_model, causal=causal,
                          has_mask=has_mask, q_tile=q_tile),
        grid=(n_layers,),
        in_specs=in_specs,
        out_specs=pl.BlockSpec((T, Dmp), lambda l: (0, 0),
                               pipeline_mode=pl.Buffered(1)),
        out_shape=jax.ShapeDtypeStruct((T, Dmp), jnp.bfloat16),
        scratch_shapes=[pltpu.VMEM((T, Dmp), jnp.float32)],
        compiler_params=pltpu.CompilerParams(
            dimension_semantics=("arbitrary",),
            vmem_limit_bytes=vmem_limit),
    )(*args)


# ----------------------------------------------------------------------------
# Vocab projection + softmax: row-tiled, "parallel" grid (dual-TC shardable).
# ----------------------------------------------------------------------------
def _output_kernel(x_ref, w_ref, b_ref, o_ref, *, vocab):
    logits = jnp.dot(x_ref[...], w_ref[...],
                     preferred_element_type=jnp.float32) + b_ref[...]
    Vp = logits.shape[-1]
    if vocab != Vp:
        col = lax.broadcasted_iota(jnp.int32, (1, Vp), 1)
        logits = jnp.where(col < vocab, logits, -1e30)   # kill padded vocab lanes
    o_ref[...] = _softmax_rows(logits, exact=True)


def output_projection(x_bf16, w, b, vocab, *, row_tile=256):
    L, Dmp = x_bf16.shape
    Vp = w.shape[1]
    tile = min(row_tile, L)
    return pl.pallas_call(
        functools.partial(_output_kernel, vocab=vocab),
        grid=(pl.cdiv(L, tile),),
        in_specs=[pl.BlockSpec((tile, Dmp), lambda i: (i, 0)),
                  pl.BlockSpec((Dmp, Vp), lambda i: (0, 0),
                               pipeline_mode=pl.Buffered(1)),
                  pl.BlockSpec((1, Vp), lambda i: (0, 0),
                               pipeline_mode=pl.Buffered(1))],
        out_specs=pl.BlockSpec((tile, Vp), lambda i: (i, 0)),
        out_shape=jax.ShapeDtypeStruct((L, Vp), jnp.float32),
        compiler_params=pltpu.CompilerParams(
            dimension_semantics=("parallel",)),
    )(x_bf16, w, b)


# ----------------------------------------------------------------------------
# Parameters (per-dimension lane padding, layer-stacked, bf16 matrices)
# ----------------------------------------------------------------------------
def init_params(key, vocab, d_model, d_k, d_v, n_enc, n_dec, d_ff=None,
                encoder_only=False):
    # TODO(synk): FFN hidden size is not in the reference hyperparams; assume d_model.
    if d_ff is None:
        d_ff = d_model
    Dmp, Dkp, Dvp, Dfp = (_round_up(d, LANE) for d in (d_model, d_k, d_v, d_ff))
    Vp = _round_up(vocab, LANE)
    Wqkv = 2 * Dkp + Dvp
    Wkv = Dkp + Dvp
    VW = max(Wqkv, Dmp, Dfp)                 # common width for tiny bias/LN rows
    q_scale = 1.0 / float(d_k) ** 0.5       # folded into Wq (and bq, zero here)

    keys = iter(jax.random.split(key, 4096))

    def rnd(r, c, scale=0.02):
        return scale * jax.random.normal(next(keys), (r, c), dtype=jnp.float32)

    def pad2(wm, rows, cols):
        out = jnp.zeros((rows, cols), jnp.float32)
        return out.at[:wm.shape[0], :wm.shape[1]].set(wm)

    def fused_qkv():
        m = jnp.zeros((Dmp, Wqkv), jnp.float32)
        m = m.at[:d_model, :d_k].set(rnd(d_model, d_k) * q_scale)
        m = m.at[:d_model, Dkp:Dkp + d_k].set(rnd(d_model, d_k))
        m = m.at[:d_model, 2 * Dkp:2 * Dkp + d_v].set(rnd(d_model, d_v))
        return m

    def fused_kv():
        m = jnp.zeros((Dmp, Wkv), jnp.float32)
        m = m.at[:d_model, :d_k].set(rnd(d_model, d_k))
        m = m.at[:d_model, Dkp:Dkp + d_v].set(rnd(d_model, d_v))
        return m

    vzero = lambda: jnp.zeros((VW,), jnp.float32)
    vgamma = lambda: jnp.zeros((VW,), jnp.float32).at[:d_model].set(1.0)

    def enc_layer():
        return dict(
            wqkv=fused_qkv(),
            wo=pad2(rnd(d_v, d_model), Dvp, Dmp),
            w1=pad2(rnd(d_model, d_ff), Dmp, Dfp),
            w2=pad2(rnd(d_ff, d_model), Dfp, Dmp),
            vecs=jnp.stack([vzero(), vzero(), vzero(), vzero(),     # bqkv bo b1 b2
                            vgamma(), vzero(), vgamma(), vzero()]),  # ln1, ln2
        )

    def dec_layer():
        return dict(
            sa_wqkv=fused_qkv(),
            sa_wo=pad2(rnd(d_v, d_model), Dvp, Dmp),
            ca_wq=pad2(rnd(d_model, d_k) * q_scale, Dmp, Dkp),
            ca_wkv=fused_kv(),
            ca_wo=pad2(rnd(d_v, d_model), Dvp, Dmp),
            w1=pad2(rnd(d_model, d_ff), Dmp, Dfp),
            w2=pad2(rnd(d_ff, d_model), Dfp, Dmp),
            vecs=jnp.stack([vzero()] * 7 +                          # biases
                           [vgamma(), vzero(), vgamma(), vzero(),
                            vgamma(), vzero()]),                    # ln1..3
        )

    def stack_layers(layers):
        out = {}
        for k in layers[0].keys():
            stacked = jnp.stack([lyr[k] for lyr in layers])
            # TODO(synk): consider fp8 (e4m3) weight storage on v7x.
            out[k] = stacked if k == "vecs" else stacked.astype(jnp.bfloat16)
        return out

    enc = stack_layers([enc_layer() for _ in range(n_enc)])
    dec = stack_layers([dec_layer() for _ in range(n_dec)])

    return {
        "d_model": d_model, "vocab": vocab, "encoder_only": encoder_only,
        "input_embedding": pad2(rnd(vocab, d_model, 1.0), vocab, Dmp),
        "output_embedding": pad2(rnd(vocab, d_model, 1.0), vocab, Dmp),
        "enc": enc, "dec": dec,
        "out_w": pad2(rnd(d_model, vocab), Dmp, Vp).astype(jnp.bfloat16),
        "out_b": jnp.zeros((1, Vp), jnp.float32),
    }


# ----------------------------------------------------------------------------
# Forward pass (mirrors MusicTransformer.forward)
# ----------------------------------------------------------------------------
def music_transformer_forward(params, source_sequence=None, target_sequence=None,
                              source_mask=None, target_mask=None,
                              encode_only=False, encoder_output=None):
    # TODO(synk): relative-position embeddings (embed_relative_positions) and
    # attention-weight caching are stateful/optional features not implemented.
    d_model = params["d_model"]
    vocab = params["vocab"]

    if source_sequence is not None:
        src = jnp.take(params["input_embedding"], source_sequence, axis=0)
        encoder_output = encoder_stack(src, params["enc"], source_mask, d_model)
        if params["encoder_only"]:
            probs = output_projection(encoder_output, params["out_w"],
                                      params["out_b"], vocab)
            return probs[:, :vocab]
    if encode_only:
        return encoder_output
    if target_sequence is not None:
        tgt = jnp.take(params["output_embedding"], target_sequence, axis=0)
        causal = isinstance(target_mask, str) and target_mask == "causal"
        mask_arr = None if (causal or target_mask is None) else target_mask
        hidden = decoder_stack(tgt, encoder_output, params["dec"], mask_arr,
                               d_model, causal=causal)
        probs = output_projection(hidden, params["out_w"], params["out_b"], vocab)
        return probs[:, :vocab]
    return None


# ----------------------------------------------------------------------------
# Demo
# ----------------------------------------------------------------------------
if __name__ == "__main__":
    VOCAB = 16
    D_MODEL = 32
    D_K = 16
    D_V = 16
    N_ENC = 2
    N_DEC = 2
    S = 8   # source length
    T = 8   # target length

    root = jax.random.PRNGKey(0)
    k_par, k_src, k_tgt = jax.random.split(root, 3)

    params = init_params(k_par, VOCAB, D_MODEL, D_K, D_V, N_ENC, N_DEC)

    source_sequence = jax.random.randint(k_src, (S,), 0, VOCAB, dtype=jnp.int32)
    target_sequence = jax.random.randint(k_tgt, (T,), 0, VOCAB, dtype=jnp.int32)

    probs = music_transformer_forward(
        params,
        source_sequence=source_sequence,
        target_sequence=target_sequence,
        source_mask=None,
        target_mask="causal",   # causal mask generated in-kernel (no (T,T) DMA)
    )
    probs = jax.block_until_ready(probs)

    assert probs.shape == (T, VOCAB)
    assert bool(jnp.all(jnp.isfinite(probs)))
    assert bool(jnp.all(jnp.abs(jnp.sum(probs, axis=-1) - 1.0) < 1e-3))
    print("KERNEL_OK")
</pallas_src>

<mosaic_0001>
module attributes {stable_mosaic.version = 11 : i64} {
  func.func @_encoder_stack_kernel(%arg0: i32, %arg1: memref<8x128xf32, #tpu.memory_space<vmem>>, %arg2: memref<1x128x384xbf16, #tpu.memory_space<vmem>>, %arg3: memref<1x128x128xbf16, #tpu.memory_space<vmem>>, %arg4: memref<1x128x128xbf16, #tpu.memory_space<vmem>>, %arg5: memref<1x128x128xbf16, #tpu.memory_space<vmem>>, %arg6: memref<1x8x384xf32, #tpu.memory_space<vmem>>, %arg7: memref<8x128xbf16, #tpu.memory_space<vmem>>, %arg8: memref<8x128xf32, #tpu.memory_space<vmem>>) attributes {dimension_semantics = [#tpu.dimension_semantics<arbitrary>], iteration_bounds = array<i64: 2>, scalar_prefetch = 0 : i64, scratch_operands = 1 : i64, tpu.core_type = #tpu.core_type<tc>, window_params = [{pipeline_mode = #tpu.pipeline_mode<synchronous>, transform_indices = @transform_0, window_bounds = array<i64: 8, 128>}, {transform_indices = @transform_1, window_bounds = array<i64: 1, 128, 384>}, {transform_indices = @transform_2, window_bounds = array<i64: 1, 128, 128>}, {transform_indices = @transform_3, window_bounds = array<i64: 1, 128, 128>}, {transform_indices = @transform_4, window_bounds = array<i64: 1, 128, 128>}, {transform_indices = @transform_5, window_bounds = array<i64: 1, 8, 384>}, {pipeline_mode = #tpu.pipeline_mode<synchronous>, transform_indices = @transform_6, window_bounds = array<i64: 8, 128>}]} {
    %c0_i32 = arith.constant 0 : i32
    %0 = arith.cmpi eq, %arg0, %c0_i32 : i32
    %1 = arith.extui %0 : i1 to i32
    %c0_i32_0 = arith.constant 0 : i32
    %2 = arith.cmpi ne, %1, %c0_i32_0 : i32
    scf.if %2 {
      %c0_40 = arith.constant 0 : index
      %c0_41 = arith.constant 0 : index
      %116 = vector.load %arg1[%c0_40, %c0_41] : memref<8x128xf32, #tpu.memory_space<vmem>>, vector<8x128xf32>
      %c0_42 = arith.constant 0 : index
      %c0_43 = arith.constant 0 : index
      %117 = vector.load %arg8[%c0_42, %c0_43] : memref<8x128xf32, #tpu.memory_space<vmem>>, vector<8x128xf32>
      tpu.vector_store %arg8[%c0_42, %c0_43], %116 {strides = array<i32>} : memref<8x128xf32, #tpu.memory_space<vmem>>, vector<8x128xf32>,
    } else {
    }
    %c0 = arith.constant 0 : index
    %c0_1 = arith.constant 0 : index
    %3 = vector.load %arg8[%c0, %c0_1] : memref<8x128xf32, #tpu.memory_space<vmem>>, vector<8x128xf32>
    %c0_2 = arith.constant 0 : index
    %c0_3 = arith.constant 0 : index
    %c0_4 = arith.constant 0 : index
    %4 = vector.load %arg6[%c0_2, %c0_3, %c0_4] : memref<1x8x384xf32, #tpu.memory_space<vmem>>, vector<1x8x384xf32>
    %5 = vector.shape_cast %4 : vector<1x8x384xf32> to vector<8x384xf32>
    %6 = tpu.iota {dimensions = array<i32: 1>} : vector<1x128xi32>
    %c32_i32 = arith.constant 32 : i32
    %7 = vector.broadcast %c32_i32 : i32 to vector<1x128xi32>
    %8 = arith.cmpi slt, %6, %7 : vector<1x128xi32>
    %9 = arith.truncf %3 : vector<8x128xf32> to vector<8x128xbf16>
    %c0_5 = arith.constant 0 : index
    %c0_6 = arith.constant 0 : index
    %c0_7 = arith.constant 0 : index
    %10 = vector.load %arg2[%c0_5, %c0_6, %c0_7] : memref<1x128x384xbf16, #tpu.memory_space<vmem>>, vector<1x128x384xbf16>
    %11 = vector.shape_cast %10 : vector<1x128x384xbf16> to vector<128x384xbf16>
    %12 = vector.extract_strided_slice %5 {offsets = [0, 0], sizes = [1, 384], strides = [1, 1]} : vector<8x384xf32> to vector<1x384xf32>
    %cst = arith.constant dense<0.000000e+00> : vector<8x384xf32>
    %13 = tpu.matmul %9, %11, %cst {dimension_numbers = #tpu.dot_dimension_numbers<[1], [0], [0], [1], [0, 0, 1, 1], [], []>} : vector<8x128xbf16>, vector<128x384xbf16>, vector<8x384xf32> -> vector<8x384xf32>
    %14 = vector.broadcast %12 : vector<1x384xf32> to vector<8x384xf32>
    %15 = arith.addf %13, %14 : vector<8x384xf32>
    %16 = vector.extract_strided_slice %15 {offsets = [0, 0], sizes = [8, 128], strides = [1, 1]} : vector<8x384xf32> to vector<8x128xf32>
    %17 = vector.extract_strided_slice %15 {offsets = [0, 128], sizes = [8, 128], strides = [1, 1]} : vector<8x384xf32> to vector<8x128xf32>
    %18 = vector.extract_strided_slice %15 {offsets = [0, 256], sizes = [8, 128], strides = [1, 1]} : vector<8x384xf32> to vector<8x128xf32>
    %19 = arith.truncf %18 : vector<8x128xf32> to vector<8x128xbf16>
    %20 = arith.truncf %17 : vector<8x128xf32> to vector<8x128xbf16>
    %21 = arith.truncf %16 : vector<8x128xf32> to vector<8x128xbf16>
    %cst_8 = arith.constant dense<0.000000e+00> : vector<8x8xf32>
    %22 = tpu.matmul %21, %20, %cst_8 {dimension_numbers = #tpu.dot_dimension_numbers<[1], [1], [0], [0], [0, 0, 1, 0], [], []>} : vector<8x128xbf16>, vector<8x128xbf16>, vector<8x8xf32> -> vector<8x8xf32>
    %cst_9 = arith.constant dense<0xFF800000> : vector<8xf32>
    %23 = vector.multi_reduction <maximumf>, %22, %cst_9 [1] : vector<8x8xf32> to vector<8xf32>
    %24 = vector.shape_cast %23 : vector<8xf32> to vector<8x1xf32>
    %25 = vector.broadcast %24 : vector<8x1xf32> to vector<8x8xf32>
    %26 = arith.subf %22, %25 : vector<8x8xf32>
    %27 = math.exp %26 : vector<8x8xf32>
    %cst_10 = arith.constant dense<0.000000e+00> : vector<8xf32>
    %28 = vector.multi_reduction <add>, %27, %cst_10 [1] : vector<8x8xf32> to vector<8xf32>
    %29 = vector.shape_cast %28 : vector<8xf32> to vector<8x1xf32>
    %30 = tpu.reciprocal %29 {approx = true} : vector<8x1xf32> -> vector<8x1xf32>
    %31 = vector.broadcast %30 : vector<8x1xf32> to vector<8x8xf32>
    %32 = arith.mulf %27, %31 : vector<8x8xf32>
    %33 = arith.truncf %32 : vector<8x8xf32> to vector<8x8xbf16>
    %cst_11 = arith.constant dense<0.000000e+00> : vector<8x128xf32>
    %34 = tpu.matmul %33, %19, %cst_11 {dimension_numbers = #tpu.dot_dimension_numbers<[1], [0], [0], [1], [0, 0, 1, 1], [], []>} : vector<8x8xbf16>, vector<8x128xbf16>, vector<8x128xf32> -> vector<8x128xf32>
    %35 = arith.truncf %34 : vector<8x128xf32> to vector<8x128xbf16>
    %c0_12 = arith.constant 0 : index
    %c0_13 = arith.constant 0 : index
    %c0_14 = arith.constant 0 : index
    %36 = vector.load %arg3[%c0_12, %c0_13, %c0_14] : memref<1x128x128xbf16, #tpu.memory_space<vmem>>, vector<1x128x128xbf16>
    %37 = vector.shape_cast %36 : vector<1x128x128xbf16> to vector<128x128xbf16>
    %38 = vector.extract_strided_slice %5 {offsets = [1, 0], sizes = [1, 128], strides = [1, 1]} : vector<8x384xf32> to vector<1x128xf32>
    %cst_15 = arith.constant dense<0.000000e+00> : vector<8x128xf32>
    %39 = tpu.matmul %35, %37, %cst_15 {dimension_numbers = #tpu.dot_dimension_numbers<[1], [0], [0], [1], [0, 0, 1, 1], [], []>} : vector<8x128xbf16>, vector<128x128xbf16>, vector<8x128xf32> -> vector<8x128xf32>
    %40 = vector.broadcast %38 : vector<1x128xf32> to vector<8x128xf32>
    %41 = arith.addf %39, %40 : vector<8x128xf32>
    %42 = arith.addf %3, %41 : vector<8x128xf32>
    %43 = vector.extract_strided_slice %5 {offsets = [4, 0], sizes = [1, 128], strides = [1, 1]} : vector<8x384xf32> to vector<1x128xf32>
    %44 = vector.extract_strided_slice %5 {offsets = [5, 0], sizes = [1, 128], strides = [1, 1]} : vector<8x384xf32> to vector<1x128xf32>
    %cst_16 = arith.constant dense<0.000000e+00> : vector<8xf32>
    %45 = vector.multi_reduction <add>, %42, %cst_16 [1] : vector<8x128xf32> to vector<8xf32>
    %46 = vector.shape_cast %45 : vector<8xf32> to vector<8x1xf32>
    %cst_17 = arith.constant 3.125000e-02 : f32
    %47 = vector.broadcast %cst_17 : f32 to vector<8x1xf32>
    %48 = arith.mulf %46, %47 : vector<8x1xf32>
    %49 = vector.broadcast %48 : vector<8x1xf32> to vector<8x128xf32>
    %50 = arith.subf %42, %49 : vector<8x128xf32>
    %cst_18 = arith.constant 0.000000e+00 : f32
    %51 = vector.shape_cast %8 : vector<1x128xi1> to vector<1x128xi1>
    %52 = vector.broadcast %51 : vector<1x128xi1> to vector<8x128xi1>
    %53 = vector.broadcast %cst_18 : f32 to vector<8x128xf32>
    %54 = arith.select %52, %50, %53 : vector<8x128xi1>, vector<8x128xf32>
    %55 = arith.mulf %54, %54 : vector<8x128xf32>
    %cst_19 = arith.constant dense<0.000000e+00> : vector<8xf32>
    %56 = vector.multi_reduction <add>, %55, %cst_19 [1] : vector<8x128xf32> to vector<8xf32>
    %57 = vector.shape_cast %56 : vector<8xf32> to vector<8x1xf32>
    %cst_20 = arith.constant 3.125000e-02 : f32
    %58 = vector.broadcast %cst_20 : f32 to vector<8x1xf32>
    %59 = arith.mulf %57, %58 : vector<8x1xf32>
    %cst_21 = arith.constant 9.99999974E-6 : f32
    %60 = vector.broadcast %cst_21 : f32 to vector<8x1xf32>
    %61 = arith.addf %59, %60 : vector<8x1xf32>
    %62 = math.rsqrt %61 : vector<8x1xf32>
    %63 = vector.broadcast %62 : vector<8x1xf32> to vector<8x128xf32>
    %64 = arith.mulf %54, %63 : vector<8x128xf32>
    %65 = vector.broadcast %43 : vector<1x128xf32> to vector<8x128xf32>
    %66 = arith.mulf %64, %65 : vector<8x128xf32>
    %67 = vector.broadcast %44 : vector<1x128xf32> to vector<8x128xf32>
    %68 = arith.addf %66, %67 : vector<8x128xf32>
    %69 = arith.truncf %68 : vector<8x128xf32> to vector<8x128xbf16>
    %c0_22 = arith.constant 0 : index
    %c0_23 = arith.constant 0 : index
    %c0_24 = arith.constant 0 : index
    %70 = vector.load %arg4[%c0_22, %c0_23, %c0_24] : memref<1x128x128xbf16, #tpu.memory_space<vmem>>, vector<1x128x128xbf16>
    %71 = vector.shape_cast %70 : vector<1x128x128xbf16> to vector<128x128xbf16>
    %72 = vector.extract_strided_slice %5 {offsets = [2, 0], sizes = [1, 128], strides = [1, 1]} : vector<8x384xf32> to vector<1x128xf32>
    %cst_25 = arith.constant dense<0.000000e+00> : vector<8x128xf32>
    %73 = tpu.matmul %69, %71, %cst_25 {dimension_numbers = #tpu.dot_dimension_numbers<[1], [0], [0], [1], [0, 0, 1, 1], [], []>} : vector<8x128xbf16>, vector<128x128xbf16>, vector<8x128xf32> -> vector<8x128xf32>
    %74 = vector.broadcast %72 : vector<1x128xf32> to vector<8x128xf32>
    %75 = arith.addf %73, %74 : vector<8x128xf32>
    %cst_26 = arith.constant 0.000000e+00 : f32
    %76 = vector.broadcast %cst_26 : f32 to vector<8x128xf32>
    %77 = arith.maximumf %75, %76 : vector<8x128xf32>
    %78 = arith.truncf %77 : vector<8x128xf32> to vector<8x128xbf16>
    %c0_27 = arith.constant 0 : index
    %c0_28 = arith.constant 0 : index
    %c0_29 = arith.constant 0 : index
    %79 = vector.load %arg5[%c0_27, %c0_28, %c0_29] : memref<1x128x128xbf16, #tpu.memory_space<vmem>>, vector<1x128x128xbf16>
    %80 = vector.shape_cast %79 : vector<1x128x128xbf16> to vector<128x128xbf16>
    %81 = vector.extract_strided_slice %5 {offsets = [3, 0], sizes = [1, 128], strides = [1, 1]} : vector<8x384xf32> to vector<1x128xf32>
    %cst_30 = arith.constant dense<0.000000e+00> : vector<8x128xf32>
    %82 = tpu.matmul %78, %80, %cst_30 {dimension_numbers = #tpu.dot_dimension_numbers<[1], [0], [0], [1], [0, 0, 1, 1], [], []>} : vector<8x128xbf16>, vector<128x128xbf16>, vector<8x128xf32> -> vector<8x128xf32>
    %83 = vector.broadcast %81 : vector<1x128xf32> to vector<8x128xf32>
    %84 = arith.addf %82, %83 : vector<8x128xf32>
    %85 = arith.addf %68, %84 : vector<8x128xf32>
    %86 = vector.extract_strided_slice %5 {offsets = [6, 0], sizes = [1, 128], strides = [1, 1]} : vector<8x384xf32> to vector<1x128xf32>
    %87 = vector.extract_strided_slice %5 {offsets = [7, 0], sizes = [1, 128], strides = [1, 1]} : vector<8x384xf32> to vector<1x128xf32>
    %cst_31 = arith.constant dense<0.000000e+00> : vector<8xf32>
    %88 = vector.multi_reduction <add>, %85, %cst_31 [1] : vector<8x128xf32> to vector<8xf32>
    %89 = vector.shape_cast %88 : vector<8xf32> to vector<8x1xf32>
    %cst_32 = arith.constant 3.125000e-02 : f32
    %90 = vector.broadcast %cst_32 : f32 to vector<8x1xf32>
    %91 = arith.mulf %89, %90 : vector<8x1xf32>
    %92 = vector.broadcast %91 : vector<8x1xf32> to vector<8x128xf32>
    %93 = arith.subf %85, %92 : vector<8x128xf32>
    %cst_33 = arith.constant 0.000000e+00 : f32
    %94 = vector.shape_cast %8 : vector<1x128xi1> to vector<1x128xi1>
    %95 = vector.broadcast %94 : vector<1x128xi1> to vector<8x128xi1>
    %96 = vector.broadcast %cst_33 : f32 to vector<8x128xf32>
    %97 = arith.select %95, %93, %96 : vector<8x128xi1>, vector<8x128xf32>
    %98 = arith.mulf %97, %97 : vector<8x128xf32>
    %cst_34 = arith.constant dense<0.000000e+00> : vector<8xf32>
    %99 = vector.multi_reduction <add>, %98, %cst_34 [1] : vector<8x128xf32> to vector<8xf32>
    %100 = vector.shape_cast %99 : vector<8xf32> to vector<8x1xf32>
    %cst_35 = arith.constant 3.125000e-02 : f32
    %101 = vector.broadcast %cst_35 : f32 to vector<8x1xf32>
    %102 = arith.mulf %100, %101 : vector<8x1xf32>
    %cst_36 = arith.constant 9.99999974E-6 : f32
    %103 = vector.broadcast %cst_36 : f32 to vector<8x1xf32>
    %104 = arith.addf %102, %103 : vector<8x1xf32>
    %105 = math.rsqrt %104 : vector<8x1xf32>
    %106 = vector.broadcast %105 : vector<8x1xf32> to vector<8x128xf32>
    %107 = arith.mulf %97, %106 : vector<8x128xf32>
    %108 = vector.broadcast %86 : vector<1x128xf32> to vector<8x128xf32>
    %109 = arith.mulf %107, %108 : vector<8x128xf32>
    %110 = vector.broadcast %87 : vector<1x128xf32> to vector<8x128xf32>
    %111 = arith.addf %109, %110 : vector<8x128xf32>
    %c0_37 = arith.constant 0 : index
    %c0_38 = arith.constant 0 : index
    %112 = vector.load %arg8[%c0_37, %c0_38] : memref<8x128xf32, #tpu.memory_space<vmem>>, vector<8x128xf32>
    tpu.vector_store %arg8[%c0_37, %c0_38], %111 {strides = array<i32>} : memref<8x128xf32, #tpu.memory_space<vmem>>, vector<8x128xf32>,
    %c1_i32 = arith.constant 1 : i32
    %113 = arith.cmpi eq, %arg0, %c1_i32 : i32
    %114 = arith.extui %113 : i1 to i32
    %c0_i32_39 = arith.constant 0 : i32
    %115 = arith.cmpi ne, %114, %c0_i32_39 : i32
    scf.if %115 {
      %116 = arith.truncf %111 : vector<8x128xf32> to vector<8x128xbf16>
      %c0_40 = arith.constant 0 : index
      %c0_41 = arith.constant 0 : index
      %117 = vector.load %arg7[%c0_40, %c0_41] : memref<8x128xbf16, #tpu.memory_space<vmem>>, vector<8x128xbf16>
      tpu.vector_store %arg7[%c0_40, %c0_41], %116 {strides = array<i32>} : memref<8x128xbf16, #tpu.memory_space<vmem>>, vector<8x128xbf16>,
    } else {
    }
    return
  }
  func.func @transform_0(%arg0: i32) -> (i32, i32) {
    %c0_i32 = arith.constant 0 : i32
    %c0_i32_0 = arith.constant 0 : i32
    %c0_i32_1 = arith.constant 0 : i32
    return %c0_i32, %c0_i32_0 : i32, i32
  }
  func.func @transform_1(%arg0: i32) -> (i32, i32, i32) {
    %c0_i32 = arith.constant 0 : i32
    %c0_i32_0 = arith.constant 0 : i32
    %c0_i32_1 = arith.constant 0 : i32
    return %arg0, %c0_i32, %c0_i32_0 : i32, i32, i32
  }
  func.func @transform_2(%arg0: i32) -> (i32, i32, i32) {
    %c0_i32 = arith.constant 0 : i32
    %c0_i32_0 = arith.constant 0 : i32
    %c0_i32_1 = arith.constant 0 : i32
    return %arg0, %c0_i32, %c0_i32_0 : i32, i32, i32
  }
  func.func @transform_3(%arg0: i32) -> (i32, i32, i32) {
    %c0_i32 = arith.constant 0 : i32
    %c0_i32_0 = arith.constant 0 : i32
    %c0_i32_1 = arith.constant 0 : i32
    return %arg0, %c0_i32, %c0_i32_0 : i32, i32, i32
  }
  func.func @transform_4(%arg0: i32) -> (i32, i32, i32) {
    %c0_i32 = arith.constant 0 : i32
    %c0_i32_0 = arith.constant 0 : i32
    %c0_i32_1 = arith.constant 0 : i32
    return %arg0, %c0_i32, %c0_i32_0 : i32, i32, i32
  }
  func.func @transform_5(%arg0: i32) -> (i32, i32, i32) {
    %c0_i32 = arith.constant 0 : i32
    %c0_i32_0 = arith.constant 0 : i32
    %c0_i32_1 = arith.constant 0 : i32
    return %arg0, %c0_i32, %c0_i32_0 : i32, i32, i32
  }
  func.func @transform_6(%arg0: i32) -> (i32, i32) {
    %c0_i32 = arith.constant 0 : i32
    %c0_i32_0 = arith.constant 0 : i32
    %c0_i32_1 = arith.constant 0 : i32
    return %c0_i32, %c0_i32_0 : i32, i32
  }
}

</mosaic_0001>

<bundles_post_ra>
// kernel: tpu_custom_call.1
= control target key start
LH: loop header
LB: loop body
LE: loop exit
PB: predicated region body
PF: predicated region fallthrough
CT: control target
= control target key end

     0   :  { %s2149_s0 = inlined_call_operand.hbm [shape: f32[8,128], index: 0, kind: input, shape index: {}]   ;;  %s2150_s1 = inlined_call_operand.hbm [shape: bf16[2,128,384], index: 1, kind: input, shape index: {}]   ;;  %s2151_s2 = inlined_call_operand.hbm [shape: bf16[2,128,128], index: 2, kind: input, shape index: {}]   ;;  %s2152_s3 = inlined_call_operand.hbm [shape: bf16[2,128,128], index: 3, kind: input, shape index: {}]   ;;  %s2153_s4 = inlined_call_operand.hbm [shape: bf16[2,128,128], index: 4, kind: input, shape index: {}]   ;;  %s2154_s5 = inlined_call_operand.hbm [shape: f32[2,8,384], index: 5, kind: input, shape index: {}]   ;;  %s2155_s6 = inlined_call_operand.hbm [shape: bf16[8,128], index: 6, kind: output, shape index: {}]  }
   0x1   :  { %2161 = sst [smem:[#allocation22_spill]] %s2149_s0 }
   0x2   :  { %2162 = sst [smem:[#allocation23_spill]] %s2150_s1 }
   0x3   :  { %2163 = sst [smem:[#allocation24_spill]] %s2152_s3 }
   0x4   :  { %11 = vsyncpa [#allocation4], 0 }
   0x5   :  { %12 = vsyncpa [#allocation7], 0 }
   0x6   :  { %14 = vsyncpa [#allocation7 + $0x1], 0 }
   0x7   :  { %15 = vsyncpa [#allocation10], 0 }
   0x8   :  { %17 = vsyncpa [#allocation10 + $0x1], 0 }
   0x9   :  { %18 = vsyncpa [#allocation13], 0 }
   0xa   :  { %20 = vsyncpa [#allocation13 + $0x1], 0 }
   0xb   :  { %21 = vsyncpa [#allocation5], 0  ;;  %s1823_s21 = smov 0   ;;  %s1825_s22 = smov 0  }
   0xc   :  { %s1827_s23 = smov 0   ;;  %s1829_s24 = smov 0  }
   0xd LB: > { %2164 = sst [smem:[#allocation20_spill]] %s1776_s23  ;;  %s1844_s25 = sadd.s32 1, %s1780_s24   ;;  %s1780_s24 = sphi %s1829_s24, %s2179_s24   ;;  %s1776_s23 = sphi %s1827_s23, %s2176_s23   ;;  %s1772_s22 = sphi %s1825_s22, %s2178_s22   ;;  %s1768_s21 = sphi %s1823_s21, %s2177_s21  }
   0xe   : > { %s55_s26 = sadd.s32 1, %s1776_s23  ;;  %s52_s27 = ssub.s32 %s1780_s24, %s1844_s25 }
   0xf   : > { %p62_p0 = scmp.ne.s32.totalorder %s1776_s23, %s1772_s22  ;;  %p53_p1 = scmp.eq.s32.totalorder %s52_s27, 0 }
  0x10   : > { %p63_p2 = scmp.eq.s32.totalorder %s1780_s24, 0  ;;  %p1472_p3 = scmp.lt.s32.totalorder %s1780_s24, 2 }
  0x11   : > { %s1854_s28 = scalar_select %p53_p1, %s1776_s23, %s55_s26  }
  0x12   : > { %p64_p4 = por %p63_p2, %p62_p0  ;;  %s229_s29 = sand.u32 1, %s1780_s24  }
  0x13   : > { %2165 = sst [smem:[#allocation21_spill]] %s1854_s28  ;;  %s1858_s30 = sand.u32 1, %s1776_s23  }
  0x14   : > { %s1427_s7 = smul.u32 192, %s1858_s30  ;;  %p1861_p5 = pnand %p1472_p3, %p64_p4 }
  0x15   : > { %s1428_s9 = smul.u32 192, %s1780_s24  ;;  %s2167_s1 = sld [smem:[#allocation23_spill]] }
  0x16   : > { %s233_s13 = scalar_lea.vmem [#allocation6], %s1427_s7  ;;  %s1871_s16 = scalar_lea.sflag [#allocation7], %s229_s29 }
  0x17   : > { %s241_s14 = sshll.u32 %s233_s13, 4  ;;  %p1875_p7 = pneg %p1861_p5  ;;  %s242_s14 = int_to_ptr.vmem [resolvable:$true] %s241_s14 }
  0x1b   : > { %s238_s12 = scalar_lea.hbm %s2167_s1, %s1428_s9  ;;  %s1529_s27 = scalar_lea.hbm %s2167_s1, 384 }
  0x1c   : > { %s239_s15 = sshll.u32 %s238_s12, 4  ;;  %s240_s15 = int_to_ptr.hbm [resolvable:$true] %s239_s15 }
  0x1d   : > { %s1522_s17 = sshra.s32 %s240_s15, 4  ;;  %s1523_s17 = int_to_ptr.hbm [resolvable:$true] %s1522_s17 }
  0x1e   : > { %s1524_s18 = scalar_lea.hbm %s1523_s17, 192  ;;  %p1530_p10 = scmp.lt.s32.totalorder %s1523_s17, %s2167_s1 }
  0x1f   : > { %p1525_p6 = scmp.ne.s32.totalorder %s1523_s17, %s1524_s18  ;;  %p1531_p11 = scmp.lt.s32.totalorder %s1529_s27, %s1524_s18 }
  0x21   : > { %p1527_p8 = pnand %p1875_p7, %p1525_p6  ;;  %p1532_p12 = por %p1531_p11, %p1530_p10 }
  0x23   : > { %p1528_p9 = pneg %p1527_p8 }
  0x25   : > { %p1533_p13 = pnand %p1532_p12, %p1528_p9 }
  0x27   : > { %1536 = shalt.err (!%p1533_p13)
}
  0x28   : > { %s1782_s10 = smov 192   ;;  %s1783_s11 = smov 12  }
  0x29   : > { %1458 = dma.hbm_to_vmem [thread:$0]  (!%p1861_p5), %s240_s15, 3072, %s242_s14, %s1871_s16, %s1782_s10, %s1782_s10, %s1783_s11  }
  0x2a   : > { %s1891_s12 = sshll.u32 %s1858_s30, 6  ;;  %s1894_s13 = sshll.u32 %s1780_s24, 6 }
  0x2b   : > { %s2169_s3 = sld [smem:[#allocation24_spill]]  ;;  %s277_s26 = scalar_lea.vmem [#allocation9], %s1891_s12 }
  0x2c   : > { %s285_s27 = sshll.u32 %s277_s26, 4  ;;  %s1903_s9 = scalar_lea.sflag [#allocation10], %s229_s29  ;;  %s286_s27 = int_to_ptr.vmem [resolvable:$true] %s285_s27 }
  0x31   : > { %s282_s20 = scalar_lea.hbm %s2169_s3, %s1894_s13  ;;  %s1559_s11 = scalar_lea.hbm %s2169_s3, 128 }
  0x32   : > { %s283_s7 = sshll.u32 %s282_s20, 4  ;;  %s284_s7 = int_to_ptr.hbm [resolvable:$true] %s283_s7 }
  0x33   : > { %s1552_s1 = sshra.s32 %s284_s7, 4  ;;  %s1553_s1 = int_to_ptr.hbm [resolvable:$true] %s1552_s1 }
  0x34   : > { %s1554_s14 = scalar_lea.hbm %s1553_s1, 64  ;;  %p1560_p3 = scmp.lt.s32.totalorder %s1553_s1, %s2169_s3 }
  0x35   : > { %p1555_p0 = scmp.ne.s32.totalorder %s1553_s1, %s1554_s14  ;;  %p1561_p4 = scmp.lt.s32.totalorder %s1559_s11, %s1554_s14 }
  0x37   : > { %p1557_p1 = pnand %p1555_p0, %p1875_p7  ;;  %p1562_p6 = por %p1561_p4, %p1560_p3 }
  0x39   : > { %p1558_p2 = pneg %p1557_p1 }
  0x3b   : > { %p1563_p8 = pnand %p1562_p6, %p1558_p2 }
  0x3d   : > { %1566 = shalt.err (!%p1563_p8)
}
  0x3e   : > { %s2156_s29 = smov 64   ;;  %s2158_s20 = smov 4  }
  0x3f   : > { %1464 = dma.hbm_to_vmem [thread:$0]  (!%p1861_p5), %s284_s7, 1024, %s286_s27, %s1903_s9, %s2156_s29, %s2156_s29, %s2158_s20  }
  0x40   : > { %s1920_s1 = sadd.s32 4294967295, %s1780_s24   ;;  %p68_p9 = scmp.ne.s32.totalorder %s1772_s22, %s1768_s21 }
  0x41   : > { %p69_p10 = scmp.eq.s32.totalorder %s1920_s1, 0  ;;  %p1158_p11 = scmp.ge.s32.totalorder %s1780_s24, 1 }
  0x42   : > { %p204_p12 = scmp.lt.s32.totalorder %s1780_s24, 3  ;;  %p1159_p0 = scmp.ne.s32.totalorder %s1920_s1, 0 }
  0x43   : > { %p1929_p13 = por %p69_p10, %p68_p9  ;;  %s2172_s0 = sld [smem:[#allocation22_spill]] }
  0x44   : > { %p1934_p1 = pnand %p1158_p11, %p204_p12  ;;  %s1786_s21 = smov [#allocation3]  }
  0x45   : > { %s218_s10 = sshll.u32 %s1786_s21, 4  ;;  %s260_s18 = scalar_lea.hbm %s2151_s2, %s1894_s13  ;;  %s219_s10 = int_to_ptr.vmem [resolvable:$true] %s218_s10 }
  0x46   : > { %p1451_p2 = pneg %p1934_p1  ;;  %s261_s29 = sshll.u32 %s260_s18, 4  ;;  %s262_s29 = int_to_ptr.hbm [resolvable:$true] %s261_s29 }
  0x47   : > { %s255_s20 = scalar_lea.vmem [#allocation8], %s1891_s12  ;;  %s1612_s7 = sshra.s32 %s262_s29, 4  ;;  %s1613_s7 = int_to_ptr.hbm [resolvable:$true] %s1612_s7 }
  0x48   : > { %p1452_p3 = pnand %p1451_p2, %p69_p10  ;;  %s263_s3 = sshll.u32 %s255_s20, 4  ;;  %s264_s3 = int_to_ptr.vmem [resolvable:$true] %s263_s3 }
  0x49   : > { %s216_s15 = sshll.u32 %s2172_s0, 4  ;;  %s1614_s14 = scalar_lea.hbm %s1613_s7, 64  ;;  %s217_s15 = int_to_ptr.hbm [resolvable:$true] %s216_s15 }
  0x4a   : > { %1454 = dma.hbm_to_vmem [thread:$0]  (!%p1452_p3), %s217_s15, 128, %s219_s10, [#allocation4]  }
  0x4b   : > { %p1615_p4 = scmp.ne.s32.totalorder %s1613_s7, %s1614_s14  ;;  %s1619_s28 = scalar_lea.hbm %s2151_s2, 128 }
  0x4c   : > { %p1620_p9 = scmp.lt.s32.totalorder %s1613_s7, %s2151_s2  ;;  %p1621_p11 = scmp.lt.s32.totalorder %s1619_s28, %s1614_s14 }
  0x4d   : > { %p1617_p6 = pnand %p1615_p4, %p1875_p7 }
  0x4e   : > { %p1622_p12 = por %p1621_p11, %p1620_p9 }
  0x4f   : > { %p1618_p8 = pneg %p1617_p6 }
  0x51   : > { %p1623_p2 = pnand %p1622_p12, %p1618_p8 }
  0x53   : > { %1626 = shalt.err (!%p1623_p2)
}
  0x54   : > { %s2173_s20 = smov 4   ;;  %s2174_s15 = smov 64  }
  0x55   : > { %1461 = dma.hbm_to_vmem [thread:$0]  (!%p1861_p5), %s262_s29, 1024, %s264_s3, %s1871_s16, %s2174_s15, %s2174_s15, %s2173_s20  }
  0x56   : > { %s304_s17 = scalar_lea.hbm %s2153_s4, %s1894_s13  ;;  %s299_s23 = scalar_lea.vmem [#allocation11], %s1891_s12 }
  0x57   : > { %s307_s18 = sshll.u32 %s299_s23, 4  ;;  %s305_s28 = sshll.u32 %s304_s17, 4  ;;  %s308_s18 = int_to_ptr.vmem [resolvable:$true] %s307_s18  ;;  %s306_s28 = int_to_ptr.hbm [resolvable:$true] %s305_s28 }
  0x58   : > { %s1642_s7 = sshra.s32 %s306_s28, 4  ;;  %s1649_s3 = scalar_lea.hbm %s2153_s4, 128  ;;  %s1643_s7 = int_to_ptr.hbm [resolvable:$true] %s1642_s7 }
  0x59   : > { %s1644_s14 = scalar_lea.hbm %s1643_s7, 64  ;;  %p1650_p8 = scmp.lt.s32.totalorder %s1643_s7, %s2153_s4 }
  0x5a   : > { %p1645_p3 = scmp.ne.s32.totalorder %s1643_s7, %s1644_s14  ;;  %p1651_p9 = scmp.lt.s32.totalorder %s1649_s3, %s1644_s14 }
  0x5c   : > { %p1647_p4 = pnand %p1645_p3, %p1875_p7  ;;  %p1652_p11 = por %p1651_p9, %p1650_p8 }
  0x5e   : > { %p1648_p6 = pneg %p1647_p4 }
  0x60   : > { %p1653_p12 = pnand %p1652_p11, %p1648_p6 }
  0x62   : > { %1656 = shalt.err (!%p1653_p12)
}
  0x63   : > { %1467 = dma.hbm_to_vmem [thread:$0]  (!%p1861_p5), %s306_s28, 1024, %s308_s18, %s1903_s9, %s2174_s15, %s2174_s15, %s2173_s20  }
  0x64   : > { %s1429_s12 = smul.u32 24, %s1858_s30  ;;  %s318_s21 = scalar_lea.sflag [#allocation13], %s1858_s30 }
  0x65   : > { %s1430_s13 = smul.u32 24, %s1780_s24  ;;  %s1679_s24 = scalar_lea.hbm %s2154_s5, 48 }
  0x66   : > { %s321_s23 = scalar_lea.vmem [#allocation12], %s1429_s12 }
  0x67   : > { %s326_s17 = scalar_lea.hbm %s2154_s5, %s1430_s13  ;;  %s330_s7 = sshll.u32 %s321_s23, 4  ;;  %s331_s7 = int_to_ptr.vmem [resolvable:$true] %s330_s7 }
  0x68   : > { %s328_s14 = sshll.u32 %s326_s17, 4  ;;  %s329_s14 = int_to_ptr.hbm [resolvable:$true] %s328_s14 }
  0x69   : > { %s1672_s11 = sshra.s32 %s329_s14, 4  ;;  %s1673_s11 = int_to_ptr.hbm [resolvable:$true] %s1672_s11 }
  0x6a   : > { %s1674_s3 = scalar_lea.hbm %s1673_s11, 24  ;;  %p1680_p6 = scmp.lt.s32.totalorder %s1673_s11, %s2154_s5 }
  0x6b   : > { %p1675_p2 = scmp.ne.s32.totalorder %s1673_s11, %s1674_s3  ;;  %p1681_p8 = scmp.lt.s32.totalorder %s1679_s24, %s1674_s3 }
  0x6d   : > { %p1677_p3 = pnand %p1675_p2, %p1875_p7  ;;  %p1682_p9 = por %p1681_p8, %p1680_p6 }
  0x6f   : > { %p1678_p4 = pneg %p1677_p3 }
  0x71   : > { %p1683_p11 = pnand %p1682_p9, %p1678_p4 }
  0x73   : > { %1686 = shalt.err (!%p1683_p11)
}
  0x74   : > { %1470 = dma.hbm_to_vmem [thread:$0]  (!%p1861_p5), %s329_s14, 384, %s331_s7, %s318_s21  }
  0x75   : > { %339 = sbr.rel (%p1934_p1) target bundleno = 1779 (0x6f3), region = 44 }
  0x7a   : > { %1747 = dma.done.wait (%p69_p10), [#allocation4], 128  }
  0x7b   : > { %1749 = vsyncadd (%p69_p10), [#allocation4], 4294967168  ;;  %s346_s30 = sand.u32 1, %s1920_s1   ;;  %s348_s19 = sand.u32 1, %s1772_s22  }
  0x7c   : > { %s1431_s28 = smul.u32 192, %s348_s19  ;;  %s347_s16 = scalar_lea.sflag [#allocation7], %s346_s30 }
  0x7e   : > { %s2007_s29 = scalar_lea.vmem [#allocation6], %s1431_s28 }
  0x7f   : > { %1751 = dma.done.wait (%p1929_p13), %s347_s16, 4096  }
  0x80   : > { %1753 = vsyncadd (%p1929_p13), %s347_s16, 4294963200  ;;  %s1174_s8 = sshll.u32 %s348_s19, 6  ;;  %s367_s12 = scalar_lea.sflag [#allocation10], %s346_s30 }
  0x81   : > { %s2013_s27 = scalar_lea.vmem [#allocation8], %s1174_s8  ;;  %s2015_s13 = scalar_lea.vmem [#allocation9], %s1174_s8 }
  0x82   : > { %1755 = dma.done.wait (%p1929_p13), %s367_s12, 2048  }
  0x83   : > { %1757 = vsyncadd (%p1929_p13), %s367_s12, 4294965248  ;;  %s1432_s0 = smul.u32 24, %s348_s19  ;;  %s2021_s10 = scalar_lea.vmem [#allocation11], %s1174_s8 }
  0x84   : > { %s387_s17 = scalar_lea.sflag [#allocation13], %s348_s19 }
  0x85   : > { %s2023_s23 = scalar_lea.vmem [#allocation12], %s1432_s0 }
  0x86   : > { %1759 = dma.done.wait (%p1929_p13), %s387_s17, 384  }
  0x87   : > { %1761 = vsyncadd (%p1929_p13), %s387_s17, 4294966912  ;;  %439 = sbr.rel (%p1159_p0) target bundleno = 142 (0x8e), region = 72 }
  0x8c   : > { %v440_v0 = vld [vmem:[#allocation3] sm:$0xff] }
  0x8d   : > { %441 = vst [vmem:[#allocation2] sm:$0xff] %v440_v0 }
  0x8e PF: > { %v1264_v1 = vld [vmem:[%s2007_s29 + $0xa8] sm:$0xf]  ;;  %v1401_v2 = vld [vmem:[%s2007_s29 + $0xb0] sm:$0xf0]  ;;  %v1400_v3 = vld [vmem:[%s2007_s29 + $0xac] sm:$0xf] }
  0x8f   : > { %v1265_v4 = vor.u32 %v1401_v2, %v1264_v1  ;;  %v1266_v5 = vld [vmem:[%s2007_s29 + $0xb4] sm:$0xf0]  ;;  %v1252_v6 = vld [vmem:[%s2007_s29 + $0x90] sm:$0xf]  ;;  %v1398_v7 = vld [vmem:[%s2007_s29 + $0x98] sm:$0xf0] }
  0x90   : > { %v1269_v8 = vor.u32 %v1400_v3, %v1266_v5  ;;  %v1397_v9 = vld [vmem:[%s2007_s29 + $0x94] sm:$0xf]  ;;  %v1254_v10 = vld [vmem:[%s2007_s29 + $0x9c] sm:$0xf0]  ;;  %v1253_v11 = vor.u32 %v1398_v7, %v1252_v6  ;;  %v1240_v13 = vld [vmem:[%s2007_s29 + $0x78] sm:$0xf] }
  0x91   : > { %613 = vmatpush.bf16.msra.mxu0 %v1265_v4  ;;  %v1257_v12 = vor.u32 %v1397_v9, %v1254_v10  ;;  %v1395_v14 = vld [vmem:[%s2007_s29 + $0x80] sm:$0xf0]  ;;  %v1394_v15 = vld [vmem:[%s2007_s29 + $0x7c] sm:$0xf]  ;;  %v1242_v16 = vld [vmem:[%s2007_s29 + $0x84] sm:$0xf0] }
  0x92   : > { %626 = vmatpush.bf16.msra.mxu1 %v1269_v8  ;;  %v1241_v17 = vor.u32 %v1395_v14, %v1240_v13  ;;  %v1245_v18 = vor.u32 %v1394_v15, %v1242_v16  ;;  %v1228_v19 = vld [vmem:[%s2007_s29 + $0x60] sm:$0xf]  ;;  %v1392_v20 = vld [vmem:[%s2007_s29 + $0x68] sm:$0xf0]  ;;  %v1391_v21 = vld [vmem:[%s2007_s29 + $0x64] sm:$0xf] }
  0x93   : > { %v1230_v22 = vld [vmem:[%s2007_s29 + $0x6c] sm:$0xf0]  ;;  %v1229_v23 = vor.u32 %v1392_v20, %v1228_v19  ;;  %v1216_v25 = vld [vmem:[%s2007_s29 + $0x48] sm:$0xf]  ;;  %v1389_v26 = vld [vmem:[%s2007_s29 + $0x50] sm:$0xf0] }
  0x94   : > { %v1233_v24 = vor.u32 %v1391_v21, %v1230_v22  ;;  %v1388_v27 = vld [vmem:[%s2007_s29 + $0x4c] sm:$0xf]  ;;  %v1218_v28 = vld [vmem:[%s2007_s29 + $0x54] sm:$0xf0]  ;;  %v1217_v29 = vor.u32 %v1389_v26, %v1216_v25  ;;  %v1204_v31 = vld [vmem:[%s2007_s29 + $0x30] sm:$0xf] }
  0x95   : > { %614 = vmatpush.bf16.msra.mxu0 %v1253_v11  ;;  %v1221_v30 = vor.u32 %v1388_v27, %v1218_v28  ;;  %v1386_v32 = vld [vmem:[%s2007_s29 + $0x38] sm:$0xf0]  ;;  %v1385_v33 = vld [vmem:[%s2007_s29 + $0x34] sm:$0xf]  ;;  %v1206_v34 = vld [vmem:[%s2007_s29 + $0x3c] sm:$0xf0] }
  0x96   : > { %627 = vmatpush.bf16.msra.mxu1 %v1257_v12  ;;  %v1205_v35 = vor.u32 %v1386_v32, %v1204_v31  ;;  %v1209_v36 = vor.u32 %v1385_v33, %v1206_v34  ;;  %v1192_v37 = vld [vmem:[%s2007_s29 + $0x18] sm:$0xf]  ;;  %v1383_v38 = vld [vmem:[%s2007_s29 + $0x20] sm:$0xf0]  ;;  %v1382_v39 = vld [vmem:[%s2007_s29 + $0x1c] sm:$0xf] }
  0x97   : > { %v1194_v40 = vld [vmem:[%s2007_s29 + $0x24] sm:$0xf0]  ;;  %v1193_v41 = vor.u32 %v1383_v38, %v1192_v37  ;;  %v1180_v43 = vld [vmem:[%s2007_s29] sm:$0xf]  ;;  %v1380_v44 = vld [vmem:[%s2007_s29 + $0x8] sm:$0xf0] }
  0x98   : > { %v1197_v42 = vor.u32 %v1382_v39, %v1194_v40  ;;  %v1379_v45 = vld [vmem:[%s2007_s29 + $0x4] sm:$0xf]  ;;  %v1182_v46 = vld [vmem:[%s2007_s29 + $0xc] sm:$0xf0]  ;;  %v1181_v47 = vor.u32 %v1380_v44, %v1180_v43  ;;  %v1402_v0 = vld [vmem:[%s2007_s29 + $0xb8] sm:$0xf0] }
  0x99   : > { %615 = vmatpush.bf16.msra.mxu0 %v1241_v17  ;;  %v2063_v48 = vld [vmem:[#allocation2] sm:$0xff]  ;;  %v1185_v49 = vor.u32 %v1379_v45, %v1182_v46  ;;  %v444_v51 = vld [vmem:[%s2023_s23 + $0x8] sm:$0xff]  ;;  %v2069_v52 = vld [vmem:[%s2023_s23] sm:$0xff]  ;;  %vm668_vm0 = vcmask 64512   ;;  %vm684_vm1 = vcmask 1043456   ;;  %p1371_p5 = scmp.ne.s32.totalorder %s1920_s1, 1 }
  0x9a   : > { %628 = vmatpush.bf16.msra.mxu1 %v1245_v18  ;;  %v449_v50 = vpack.c.bf16 %v2063_v48, %v2063_v48  ;;  %v483_v53 = vperm.slane %v444_v51, 0  ;;  %v482_v55 = vperm.slane %v2069_v52, 0  ;;  %v1272_v63 = vld [vmem:[%s2007_s29 + $0xb0] sm:$0xf]  ;;  %v1260_v1 = vld [vmem:[%s2007_s29 + $0x98] sm:$0xf] }
  0x9b   : > { %v1273_v2 = vor.u32 %v1402_v0, %v1272_v63  ;;  %v1399_v3 = vld [vmem:[%s2007_s29 + $0xa0] sm:$0xf0]  ;;  %v1248_v5 = vld [vmem:[%s2007_s29 + $0x80] sm:$0xf]  ;;  %v1396_v6 = vld [vmem:[%s2007_s29 + $0x88] sm:$0xf0] }
  0x9c   : > { %v1261_v4 = vor.u32 %v1399_v3, %v1260_v1  ;;  %v1249_v7 = vor.u32 %v1396_v6, %v1248_v5  ;;  %v1236_v8 = vld [vmem:[%s2007_s29 + $0x68] sm:$0xf]  ;;  %v1393_v9 = vld [vmem:[%s2007_s29 + $0x70] sm:$0xf0]  ;;  %v1224_v11 = vld [vmem:[%s2007_s29 + $0x50] sm:$0xf] }
  0x9d   : > { %616 = vmatpush.bf16.msra.mxu0 %v1229_v23  ;;  %639 = vmatpush.bf16.msra.mxu2 %v1273_v2  ;;  %v1237_v10 = vor.u32 %v1393_v9, %v1236_v8  ;;  %v1390_v12 = vld [vmem:[%s2007_s29 + $0x58] sm:$0xf0]  ;;  %v1212_v14 = vld [vmem:[%s2007_s29 + $0x38] sm:$0xf]  ;;  %v1387_v15 = vld [vmem:[%s2007_s29 + $0x40] sm:$0xf0] }
  0x9e   : > { %629 = vmatpush.bf16.msra.mxu1 %v1233_v24  ;;  %v1225_v13 = vor.u32 %v1390_v12, %v1224_v11  ;;  %v1213_v16 = vor.u32 %v1387_v15, %v1212_v14  ;;  %v1200_v17 = vld [vmem:[%s2007_s29 + $0x20] sm:$0xf]  ;;  %v1384_v18 = vld [vmem:[%s2007_s29 + $0x28] sm:$0xf0]  ;;  %v1188_v21 = vld [vmem:[%s2007_s29 + $0x8] sm:$0xf] }
  0x9f   : > { %v1201_v19 = vor.u32 %v1384_v18, %v1200_v17  ;;  %v1381_v22 = vld [vmem:[%s2007_s29 + $0x10] sm:$0xf0]  ;;  %v1410_v38 = vld [vmem:[%s2013_s27 + $0x38] sm:$0xff]  ;;  %v1408_v40 = vld [vmem:[%s2013_s27 + $0x28] sm:$0xff] }
  0xa0   : > { %v1189_v24 = vor.u32 %v1381_v22, %v1188_v21  ;;  %v445_v31 = vld [vmem:[%s2023_s23 + $0x10] sm:$0xff]  ;;  %v1415_v5 = vld [vmem:[%s2015_s13 + $0x20] sm:$0xff]  ;;  %v1414_v6 = vld [vmem:[%s2015_s13 + $0x18] sm:$0xff] }
  0xa1   : > { %617 = vmatpush.bf16.msra.mxu0 %v1217_v29  ;;  %640 = vmatpush.bf16.msra.mxu2 %v1261_v4  ;;  %v484_v32 = vperm.slane %v445_v31, 0  ;;  %v1409_v39 = vld [vmem:[%s2013_s27 + $0x30] sm:$0xff]  ;;  %v1404_v45 = vld [vmem:[%s2013_s27 + $0x8] sm:$0xff]  ;;  %v1411_v9 = vld [vmem:[%s2015_s13] sm:$0xff] }
  0xa2   : > { %630 = vmatpush.bf16.msra.mxu1 %v1221_v30  ;;  %v1405_v43 = vld [vmem:[%s2013_s27 + $0x10] sm:$0xff]  ;;  %v1416_v4 = vld [vmem:[%s2015_s13 + $0x28] sm:$0xff] }
  0xa3   : > { %v1417_v3 = vld [vmem:[%s2015_s13 + $0x30] sm:$0xff]  ;;  %v1412_v8 = vld [vmem:[%s2015_s13 + $0x8] sm:$0xff] }
  0xa4   : > { %v1424_v15 = vld [vmem:[%s2021_s10 + $0x28] sm:$0xff]  ;;  %v1421_v22 = vld [vmem:[%s2021_s10 + $0x10] sm:$0xff] }
  0xa5   : > { %618 = vmatpush.bf16.msra.mxu0 %v1205_v35  ;;  %641 = vmatpush.bf16.msra.mxu2 %v1249_v7  ;;  %v1413_v7 = vld [vmem:[%s2015_s13 + $0x10] sm:$0xff] }
  0xa6   : > { %631 = vmatpush.bf16.msra.mxu1 %v1209_v36 }
  0xa9   : > { %619 = vmatpush.bf16.msra.mxu0 %v1193_v41  ;;  %642 = vmatpush.bf16.msra.mxu2 %v1237_v10  ;;  %v1407_v41 = vld [vmem:[%s2013_s27 + $0x20] sm:$0xff]  ;;  %v1426_v10 = vld [vmem:[%s2021_s10 + $0x38] sm:$0xff] }
  0xaa   : > { %632 = vmatpush.bf16.msra.mxu1 %v1197_v42  ;;  %v1406_v42 = vld [vmem:[%s2013_s27 + $0x18] sm:$0xff] }
  0xad   : > { %620 = vmatpush.bf16.msra.mxu0 %v1181_v47  ;;  %643 = vmatpush.bf16.msra.mxu2 %v1225_v13  ;;  %v1425_v13 = vld [vmem:[%s2021_s10 + $0x30] sm:$0xff] }
  0xae   : > { %633 = vmatpush.bf16.msra.mxu1 %v1185_v49 }
  0xb0   : > { %621 = vmatmul.bf16.vlgmr.msra.gmra.mxu0 %v449_v50 }
  0xb1   : > { %634 = vmatmul.bf16.vlgmr.msra.gmra.mxu1 %v449_v50  ;;  %644 = vmatpush.bf16.msra.mxu2 %v1213_v16  ;;  %v1423_v16 = vld [vmem:[%s2021_s10 + $0x20] sm:$0xff] }
  0xb2   : > { %954 = vmatpush.bf16.msrb.mxu1 %v1426_v10 }
  0xb5   : > { %645 = vmatpush.bf16.msra.mxu2 %v1201_v19  ;;  %v1422_v19 = vld [vmem:[%s2021_s10 + $0x18] sm:$0xff] }
  0xb6   : > { %955 = vmatpush.bf16.msrb.mxu1 %v1425_v13 }
  0xb9   : > { %646 = vmatpush.bf16.msra.mxu2 %v1189_v24 }
  0xba   : > { %956 = vmatpush.bf16.msrb.mxu1 %v1424_v15 }
  0xbc   : > { %647 = vmatmul.bf16.vlgmr.msra.gmra.mxu2 %v449_v50  ;;  %v1403_v50 = vld [vmem:[%s2013_s27] sm:$0xff] }
  0xbe   : > { %957 = vmatpush.bf16.msrb.mxu1 %v1423_v16 }
  0xc2   : > { %958 = vmatpush.bf16.msrb.mxu1 %v1422_v19 }
  0xc6   : > { %959 = vmatpush.bf16.msrb.mxu1 %v1421_v22 }
 0x12d   : > { %v622_v54 = vpop.f32.mrf.mxu0 }
 0x12e   : > { %v635_v56 = vpop.f32.mrf.mxu1  ;;  %v623_v59 = vadd.f32 %v622_v54, %v482_v55  ;;  %v718_v55 = vperm.slane %v2069_v52, 1 }
 0x12f   : > { %v636_v57 = vadd.f32 %v635_v56, %v483_v53 }
 0x130   : > { %v654_v61 = vpack.c.bf16 %v623_v59, %v623_v59 }
 0x131   : > { %v653_v58 = vpack.c.bf16 %v636_v57, %v636_v57 }
 0x133   : > { %662 = vmatpush.bf16.xpose.msra.mxu3 %v653_v58 }
 0x135   : > { %v624_v60 = vpop.f32.mrf.mxu0 }
 0x136   : > { %v637_v62 = vpop.f32.mrf.mxu1  ;;  %v1418_v60 = vld [vmem:[%s2015_s13 + $0x38] sm:$0xff] }
 0x137   : > { %874 = vmatpush.bf16.msrb.mxu0 %v1418_v60 }
 0x13a   : > { %663 = vmatmul.bf16.vlgmr.msra.gmra.mxu3 %v654_v61  ;;  %v446_v61 = vlaneseq }
 0x13b   : > { %875 = vmatpush.bf16.msrb.mxu0 %v1417_v3 }
 0x13c   : > { %v2103_v62 = vand.u32 127, %v446_v61  ;;  %v989_v61 = vperm.slane %v2069_v52, 6 }
 0x13e   : > { %vm448_vm2 = vcmp.lt.s32.totalorder %v2103_v62, 32  ;;  %v991_v62 = vperm.slane %v2069_v52, 7 }
 0x13f   : > { %v648_v33 = vpop.f32.mrf.mxu2  ;;  %876 = vmatpush.bf16.msrb.mxu0 %v1416_v4 }
 0x140   : > { %v649_v34 = vadd.f32 %v648_v33, %v484_v32  ;;  %v1420_v32 = vld [vmem:[%s2021_s10 + $0x8] sm:$0xff]  ;;  %v1419_v33 = vld [vmem:[%s2021_s10] sm:$0xff] }
 0x141   : > { %960 = vmatpush.bf16.msrb.mxu1 %v1420_v32 }
 0x142   : > { %v652_v35 = vpack.c.bf16 %v649_v34, %v649_v34  ;;  %v825_v34 = vperm.slane %v2069_v52, 2 }
 0x143   : > { %877 = vmatpush.bf16.msrb.mxu0 %v1415_v5 }
 0x144   : > { %v686_v36 = vsel %vm684_vm1, %v652_v35, 0 }
 0x145   : > { %695 = vmatpush.bf16.msrb.mxu3 %v686_v36  ;;  %961 = vmatpush.bf16.msrb.mxu1 %v1419_v33 }
 0x147   : > { %v650_v37 = vpop.f32.mrf.mxu2  ;;  %878 = vmatpush.bf16.msrb.mxu0 %v1414_v6 }
 0x149   : > { %767 = vmatpush.bf16.msra.mxu3 %v1410_v38 }
 0x14b   : > { %879 = vmatpush.bf16.msrb.mxu0 %v1413_v7 }
 0x14d   : > { %768 = vmatpush.bf16.msra.mxu3 %v1409_v39 }
 0x14f   : > { %880 = vmatpush.bf16.msrb.mxu0 %v1412_v8 }
 0x151   : > { %769 = vmatpush.bf16.msra.mxu3 %v1408_v40  ;;  %v905_v40 = vperm.slane %v2069_v52, 3 }
 0x153   : > { %881 = vmatpush.bf16.msrb.mxu0 %v1411_v9 }
 0x155   : > { %770 = vmatpush.bf16.msra.mxu3 %v1407_v41 }
 0x159   : > { %771 = vmatpush.bf16.msra.mxu3 %v1406_v42 }
 0x15d   : > { %772 = vmatpush.bf16.msra.mxu3 %v1405_v43 }
 0x161   : > { %773 = vmatpush.bf16.msra.mxu3 %v1404_v45 }
 0x165   : > { %774 = vmatpush.bf16.msra.mxu3 %v1403_v50 }
 0x1bd   : > { %v664_v20 = vpop.f32.mrf.mxu3 }
 0x1be   : > { %v669_v23 = vsel %vm668_vm0, %v664_v20, -inf }
 0x1bf   : > { %670 = vmax.xlane.f32.xlu0 %v669_v23 }
 0x1c5   : > { %v666_v25 = vpop.f32.mrf.mxu3 }
 0x1c6   : > { %v804_v25 = vperm.slane %v2069_v52, 4 }
 0x232   : > { %v671_v26 = vpop.xlane.xlu0 %670 }
 0x233   : > { %v672_v27 = vsub.f32 %v664_v20, %v671_v26 }
 0x235   : > { %v673_v28 = vmul.f32 1.442695, %v672_v27 }
 0x237   : > { %1514 = vpow2.f32 %v673_v28  ;;  %v806_v28 = vperm.slane %v2069_v52, 5 }
 0x23d   : > { %v1515_v29 = vpop.eup %1514 }
 0x23e   : > { %v675_v30 = vsel %vm668_vm0, %v1515_v29, 0.0 }
 0x23f   : > { %676 = vadd.xlane.f32.xlu0 %v675_v30 }
 0x2b2   : > { %v677_v44 = vpop.xlane.xlu0 %676 }
 0x2b3   : > { %1516 = vrcp.f32 %v677_v44 }
 0x2b9   : > { %v1517_v46 = vpop.eup %1516 }
 0x2ba   : > { %v679_v47 = vmul.f32 %v1517_v46, %v1515_v29 }
 0x2bc   : > { %v680_v49 = vpack.c.bf16 %v679_v47, %v679_v47 }
 0x2be   : > { %1274 = vmatmul.msk.bf16.vlgmr.msrb.gmra.mxu3 %vm668_vm0, %v680_v49 }
 0x341   : > { %v697_v51 = vpop.f32.mrf.mxu3 }
 0x342   : > { %v701_v53 = vpack.c.bf16 %v697_v51, %v697_v51 }
 0x344   : > { %775 = vmatmul.bf16.vlgmr.msra.gmra.mxu3 %v701_v53 }
 0x349   : > { %v699_v54 = vpop.f32.mrf.mxu3 }
 0x3c7   : > { %v776_v56 = vpop.f32.mrf.mxu3 }
 0x3c8   : > { %v777_v57 = vadd.f32 %v776_v56, %v718_v55 }
 0x3ca   : > { %v780_v58 = vadd.f32 %v777_v57, %v2063_v48 }
 0x3cc   : > { %781 = vadd.xlane.f32.xlu1 %v780_v58 }
 0x3cf   : > { %v778_v59 = vpop.f32.mrf.mxu3 }
 0x43f   : > { %v782_v63 = vpop.xlane.xlu1 %781 }
 0x440   : > { %v783_v0 = vmul.f32 0.03125, %v782_v63 }
 0x442   : > { %v784_v1 = vsub.f32 %v780_v58, %v783_v0 }
 0x444   : > { %v787_v48 = vsel %vm448_vm2, %v784_v1, 0.0 }
 0x445   : > { %v788_v2 = vmul.f32 %v787_v48, %v787_v48 }
 0x447   : > { %789 = vadd.xlane.f32.xlu1 %v788_v2 }
 0x4ba   : > { %v790_v11 = vpop.xlane.xlu1 %789 }
 0x4bb   : > { %v791_v12 = vmul.f32 0.03125, %v790_v11 }
 0x4bd   : > { %v792_v14 = vadd.f32 1e-05, %v791_v12 }
 0x4bf   : > { %1518 = vrsqrt.f32 %v792_v14  ;;  %vm799_vm4 = vweird.f32 %v792_v14 }
 0x4c5   : > { %v1519_v17 = vpop.eup %1518 }
 0x4c6   : > { %v794_v18 = vmul.f32 %v1519_v17, %v792_v14  ;;  %vm800_vm3 = vweird.f32 %v1519_v17 }
 0x4c7   : > { %vm801_vm5 = vmor %vm799_vm4, %vm800_vm3 }
 0x4c8   : > { %v795_v20 = vmul.f32 %v1519_v17, %v794_v18 }
 0x4ca   : > { %v796_v21 = vmul.f32 0.5, %v795_v20 }
 0x4cc   : > { %v797_v23 = vsub.f32 1.5, %v796_v21 }
 0x4ce   : > { %v798_v24 = vmul.f32 %v1519_v17, %v797_v23 }
 0x4d0   : > { %v802_v26 = vsel %vm801_vm5, %v1519_v17, %v798_v24 }
 0x4d1   : > { %v803_v27 = vmul.f32 %v802_v26, %v787_v48 }
 0x4d3   : > { %v805_v29 = vmul.f32 %v804_v25, %v803_v27 }
 0x4d5   : > { %v807_v30 = vadd.f32 %v806_v28, %v805_v29 }
 0x4d7   : > { %v808_v31 = vpack.c.bf16 %v807_v30, %v807_v30 }
 0x4d9   : > { %882 = vmatmul.bf16.vlgmr.msrb.gmra.mxu0 %v808_v31 }
 0x556   : > { %v883_v35 = vpop.f32.mrf.mxu0 }
 0x557   : > { %v884_v36 = vadd.f32 %v883_v35, %v825_v34 }
 0x559   : > { %v887_v37 = vmax.f32 %v884_v36, 0.0 }
 0x55b   : > { %v888_v38 = vpack.c.bf16 %v887_v37, %v887_v37 }
 0x55d   : > { %962 = vmatmul.bf16.vlgmr.msrb.gmra.mxu1 %v888_v38 }
 0x55e   : > { %v885_v39 = vpop.f32.mrf.mxu0 }
 0x5da   : > { %v963_v41 = vpop.f32.mrf.mxu1 }
 0x5db   : > { %v964_v42 = vadd.f32 %v963_v41, %v905_v40 }
 0x5dd   : > { %v967_v43 = vadd.f32 %v964_v42, %v807_v30 }
 0x5df   : > { %968 = vadd.xlane.f32.xlu2 %v967_v43 }
 0x5e2   : > { %v965_v44 = vpop.f32.mrf.mxu1 }
 0x652   : > { %v969_v45 = vpop.xlane.xlu2 %968 }
 0x653   : > { %v970_v46 = vmul.f32 0.03125, %v969_v45 }
 0x655   : > { %v971_v47 = vsub.f32 %v967_v43, %v970_v46 }
 0x657   : > { %v972_v49 = vsel %vm448_vm2, %v971_v47, 0.0 }
 0x658   : > { %v973_v50 = vmul.f32 %v972_v49, %v972_v49 }
 0x65a   : > { %974 = vadd.xlane.f32.xlu2 %v973_v50 }
 0x6cd   : > { %v975_v51 = vpop.xlane.xlu2 %974 }
 0x6ce   : > { %v976_v53 = vmul.f32 0.03125, %v975_v51 }
 0x6d0   : > { %v977_v54 = vadd.f32 1e-05, %v976_v53 }
 0x6d2   : > { %1520 = vrsqrt.f32 %v977_v54  ;;  %vm984_vm7 = vweird.f32 %v977_v54 }
 0x6d8   : > { %v1521_v55 = vpop.eup %1520 }
 0x6d9   : > { %v979_v56 = vmul.f32 %v1521_v55, %v977_v54  ;;  %vm985_vm6 = vweird.f32 %v1521_v55 }
 0x6da   : > { %vm986_vm8 = vmor %vm984_vm7, %vm985_vm6 }
 0x6db   : > { %v980_v57 = vmul.f32 %v1521_v55, %v979_v56 }
 0x6dd   : > { %v981_v58 = vmul.f32 0.5, %v980_v57 }
 0x6df   : > { %v982_v59 = vsub.f32 1.5, %v981_v58 }
 0x6e1   : > { %v983_v60 = vmul.f32 %v1521_v55, %v982_v59 }
 0x6e3   : > { %v987_v63 = vsel %vm986_vm8, %v1521_v55, %v983_v60 }
 0x6e4   : > { %v988_v0 = vmul.f32 %v987_v63, %v972_v49 }
 0x6e6   : > { %v990_v1 = vmul.f32 %v989_v61, %v988_v0  ;;  %997 = sbr.rel (%p1371_p5) target bundleno = 1774 (0x6ee), region = 76 }
 0x6e8   : > { %v992_v48 = vadd.f32 %v991_v62, %v990_v1 }
 0x6ea   : > { %993 = vst [vmem:[#allocation2] sm:$0xff] %v992_v48 }
 0x6eb   : > { %v998_v2 = vpack.c.bf16 %v992_v48, %v992_v48 }
 0x6ed   : > { %999 = vst [vmem:[#allocation14] sm:$0xf] %v998_v2 }
 0x6ee PF: > { %p1474_p7 = scmp.eq.s32.totalorder %s1920_s1, 1  ;;  %s1787_s26 = smov [#allocation14]  }
 0x6ef   : > { %s1006_s7 = sshll.u32 %s1787_s26, 4  ;;  %s1008_s11 = sshll.u32 %s2155_s6, 4  ;;  %s1007_s7 = int_to_ptr.vmem [resolvable:$true] %s1006_s7  ;;  %s1009_s11 = int_to_ptr.hbm [resolvable:$true] %s1008_s11 }
 0x6f0   : > { %1448 = dma.vmem_to_hbm [thread:$0]  (%p1474_p7), %s1007_s7, 64, %s1009_s11, [#allocation5]  }
 0x6f1   : > { %1763 = dma.done.wait (%p1474_p7), [#allocation5], 64  }
 0x6f2   : > { %1765 = vsyncadd (%p1474_p7), [#allocation5], 4294967232 }
 0x6f3 PF: > { %s2175_s3 = sld [smem:[#allocation20_spill]]  ;;  %p24_p10 = scmp.ge.s32.totalorder %s1844_s25, 4  }
 0x6f4   : > { %s2176_s23 = sld [smem:[#allocation21_spill]]  ;;  %s2177_s21 = smov %s1772_s22 }
 0x6f5   : > { %s2179_s24 = smov %s1844_s25  ;;  %26 = sbr.rel (!%p24_p10) target bundleno = 13 (0xd), region = 142 }
 0x6f9   : > { %s2178_s22 = smov %s2175_s3 }
 0x6fa   :  { %1022 = vsyncpa [#allocation4], 1 }
 0x6fb   :  { %1024 = vsyncpa [#allocation4 + $0x1], 1 }
 0x6fc   :  { %1025 = vsyncpa [#allocation7], 1 }
 0x6fd   :  { %1027 = vsyncpa [#allocation7 + $0x1], 1 }
 0x6fe   :  { %1028 = vsyncpa [#allocation10], 1 }
 0x6ff   :  { %1030 = vsyncpa [#allocation10 + $0x1], 1 }
 0x700   :  { %1031 = vsyncpa [#allocation13], 1 }
 0x701   :  { %1033 = vsyncpa [#allocation13 + $0x1], 1 }
 0x702   :  { %1034 = vsyncpa [#allocation5], 1 }
 0x703   :  { %1036 = vsyncpa [#allocation5 + $0x1], 1 }

</bundles_post_ra>
